<compile_context>
chip_gen: v6e
topology: v6e:2x2x1
jax: 0.10.0
libtpu: 0.0.40
codegen_flags: <defaults>
</compile_context>

<pallas_src>
import jax
import jax.numpy as jnp
from jax.experimental import pallas as pl
from jax.experimental.pallas import tpu as pltpu


def _cdiv(a, b):
    return -(-a // b)


def _round_up(x, m):
    return _cdiv(x, m) * m


def _choose_batch_tile(B, Rp, K, Hp, *, row_target=512, vmem_budget_bytes=24 << 20):
    """Images per grid step: fill >= row_target MXU rows, stay inside a v7x-safe
    VMEM budget, and keep at least 2 grid steps (v7x has 2 TensorCores)."""
    bt_rows = max(1, _cdiv(row_target, Rp))
    per_image = 2 * (Rp * K * 2 + Rp * Hp * 4)       # double-buffered input + output
    resident = K * Hp * 2 + bt_rows * Rp * Hp * 4    # weight + tiled pos (upper bound)
    bt_vmem = max(1, (vmem_budget_bytes - resident) // per_image)
    bt = int(min(bt_rows, bt_vmem, B))
    if B >= 2:
        bt = min(bt, max(1, B // 2))                 # keep grid length >= 2
    return max(1, bt)


def _embeddings_kernel(patches_ref, w_ref, pos_ref, out_ref):
    # patches_ref: (Mb, K) bf16   w_ref: (K, Hp) bf16   pos_ref: (Mb, Hp) f32
    # out_ref:     (Mb, Hp) f32
    acc = jnp.dot(patches_ref[...], w_ref[...],
                  preferred_element_type=jnp.float32)        # f32 accumulation
    out_ref[...] = (acc + pos_ref[...]).astype(out_ref.dtype)  # single dense store


def _run_pallas(patches_flat, w_pad, pos_tiled, Mb, K, Hp, grid_len,
                single_buffer_invariants):
    if single_buffer_invariants:
        # Grid-invariant operands: no need to double-buffer (saves VMEM on v7x).
        inv_kwargs = dict(pipeline_mode=pl.Buffered(1))
    else:
        inv_kwargs = {}
    w_spec = pl.BlockSpec((K, Hp), lambda i: (0, 0), **inv_kwargs)
    pos_spec = pl.BlockSpec((Mb, Hp), lambda i: (0, 0), **inv_kwargs)

    # Explicit (modest) VMEM budget: double-buffered streams + resident invariants.
    est = 2 * (Mb * K * 2 + Mb * Hp * 4) + (K * Hp * 2 + Mb * Hp * 4)
    vmem_limit = int(min(48 << 20, max(16 << 20, 2 * est)))  # stays under v7x's 64 MiB

    return pl.pallas_call(
        _embeddings_kernel,
        out_shape=jax.ShapeDtypeStruct((grid_len * Mb, Hp), jnp.float32),
        grid=(grid_len,),
        in_specs=[
            pl.BlockSpec((Mb, K), lambda i: (i, 0)),   # patch rows for this step
            w_spec,                                    # resident weight
            pos_spec,                                  # resident pos(+bias,+cls) table
        ],
        out_specs=pl.BlockSpec((Mb, Hp), lambda i: (i, 0)),
        compiler_params=pltpu.CompilerParams(
            dimension_semantics=("parallel",),
            vmem_limit_bytes=vmem_limit,
        ),
    )(patches_flat, w_pad, pos_tiled)


def embeddings_forward(x_nchw, conv_w, conv_b, cls_token, pos_emb, patch_size):
    """x_nchw: (B, C, Himg, Wimg) f32.  Returns (B, num_patches + 1, hidden) f32."""
    B, C, Hi, Wi = x_nchw.shape
    P = patch_size
    gh, gw = Hi // P, Wi // P
    N = gh * gw
    Hd = conv_w.shape[0]
    K = C * P * P

    Rp = _round_up(N + 1, 8)      # rows per image (patches + cls slot), sublane aligned
    Hp = _round_up(Hd, 128)       # lane-dense output width (no-op when Hd % 128 == 0)

    Bt = _choose_batch_tile(B, Rp, K, Hp)
    grid_len = _cdiv(B, Bt)
    Bpad = grid_len * Bt
    Mb = Bt * Rp                  # matmul rows per grid step

    # ---- unfold NCHW -> (B, N, K), feature order (c, ph, pw) == Conv2d weight order.
    # Cast to bf16 BEFORE the transpose so the materialized copy is half the bytes.
    # TODO(synk): fuse this unfold into the kernel (row-strip BlockSpec + in-VMEM
    # rearrange) to remove this extra HBM pass entirely.
    xb = x_nchw.astype(jnp.bfloat16)
    patches = xb.reshape(B, C, gh, P, gw, P).transpose(0, 2, 4, 1, 3, 5).reshape(B, N, K)
    # Pad rows (cls slot + sublane pad) and batch tail with zeros: 0 @ W + pos_plus
    # then yields exactly the precomputed cls / pad rows.
    patches = jnp.pad(patches, ((0, Bpad - B), (0, Rp - N), (0, 0)))
    patches_flat = patches.reshape(Bpad * Rp, K)

    # ---- Conv2d weight (Hd, C, P, P) -> (K, Hp) bf16, zero-padded along lanes.
    w_mat = conv_w.reshape(Hd, K).T.astype(jnp.bfloat16)
    w_pad = jnp.zeros((K, Hp), jnp.bfloat16).at[:, :Hd].set(w_mat)

    # ---- fold conv bias and cls token into one f32 additive table:
    #   rows 0..N-1: pos[r] + conv_b       row N: pos[N] + cls_token      rows >N: 0
    pos = pos_emb.reshape(N + 1, Hd).astype(jnp.float32)
    pos_plus = jnp.zeros((Rp, Hp), jnp.float32)
    pos_plus = pos_plus.at[:N, :Hd].set(pos[:N] + conv_b[None, :].astype(jnp.float32))
    pos_plus = pos_plus.at[N, :Hd].set(pos[N] + cls_token.reshape(Hd).astype(jnp.float32))
    pos_tiled = jnp.tile(pos_plus, (Bt, 1))        # (Mb, Hp), grid-invariant

    try:
        out_flat = _run_pallas(patches_flat, w_pad, pos_tiled, Mb, K, Hp, grid_len, True)
    except Exception:
        # pipeline_mode=pl.Buffered(1) not supported on this jax build -> default buffering.
        out_flat = _run_pallas(patches_flat, w_pad, pos_tiled, Mb, K, Hp, grid_len, False)

    out = out_flat.reshape(Bpad, Rp, Hp)[:B, :N + 1, :Hd]
    # TODO(synk): dropout is eval-mode identity here (no RNG mask applied).
    return out


def reference_forward(x_nchw, conv_w, conv_b, cls_token, pos_emb, patch_size,
                      matmul_dtype=jnp.float32):
    """Pure-JAX reference mirroring the PyTorch forward (eval mode)."""
    B, C, Hi, Wi = x_nchw.shape
    P = patch_size
    gh, gw = Hi // P, Wi // P
    N = gh * gw
    Hd = conv_w.shape[0]
    patches = x_nchw.reshape(B, C, gh, P, gw, P).transpose(0, 2, 4, 1, 3, 5)
    patches = patches.reshape(B, N, C * P * P)
    w = conv_w.reshape(Hd, -1).T
    emb = jnp.dot(patches.astype(matmul_dtype), w.astype(matmul_dtype),
                  preferred_element_type=jnp.float32)
    emb = emb + conv_b[None, None, :]
    cls = jnp.broadcast_to(cls_token.reshape(1, 1, Hd), (B, 1, Hd))
    seq = jnp.concatenate([emb, cls], axis=1)      # cls appended AFTER patches (spec)
    return seq + pos_emb.reshape(1, N + 1, Hd)


if __name__ == "__main__":
    # Small shapes consistent with the module:
    #   image_size=16, patch_size=4, in_channels=4, hidden_size=32, dropout=0.0
    B, C, IMG, P, HID = 2, 4, 16, 4, 32
    N = (IMG // P) ** 2            # 16 patches
    K = C * P * P                  # 64

    key = jax.random.PRNGKey(0)
    kx, kw, kb, kc, kp = jax.random.split(key, 5)

    x = jax.random.normal(kx, (B, C, IMG, IMG), dtype=jnp.float32)
    conv_w = jax.random.normal(kw, (HID, C, P, P), dtype=jnp.float32) * 0.05
    conv_b = jax.random.normal(kb, (HID,), dtype=jnp.float32) * 0.05
    cls_token = jax.random.normal(kc, (1, 1, HID), dtype=jnp.float32)
    pos_emb = jax.random.normal(kp, (1, N + 1, HID), dtype=jnp.float32)

    out = embeddings_forward(x, conv_w, conv_b, cls_token, pos_emb, P)
    out = jax.block_until_ready(out)

    assert out.shape == (B, N + 1, HID), out.shape
    # Tight check against a reference with the same bf16-matmul / f32-accumulate numerics.
    ref_bf16 = reference_forward(x, conv_w, conv_b, cls_token, pos_emb, P,
                                 matmul_dtype=jnp.bfloat16)
    assert jnp.allclose(out, ref_bf16, atol=1e-3, rtol=1e-3), "mismatch vs bf16 reference"
    # Loose check against the full-f32 reference (bf16 input rounding only).
    ref_f32 = reference_forward(x, conv_w, conv_b, cls_token, pos_emb, P)
    assert jnp.allclose(out, ref_f32, atol=5e-2, rtol=5e-2), "mismatch vs f32 reference"

    print("KERNEL_OK")
</pallas_src>

<mosaic_0001>
module attributes {stable_mosaic.version = 11 : i64} {
  func.func @_embeddings_kernel(%arg0: i32, %arg1: memref<24x64xbf16, #tpu.memory_space<vmem>>, %arg2: memref<64x128xbf16, #tpu.memory_space<vmem>>, %arg3: memref<24x128xf32, #tpu.memory_space<vmem>>, %arg4: memref<24x128xf32, #tpu.memory_space<vmem>>) attributes {dimension_semantics = [#tpu.dimension_semantics<parallel>], iteration_bounds = array<i64: 2>, scalar_prefetch = 0 : i64, scratch_operands = 0 : i64, tpu.core_type = #tpu.core_type<tc>, window_params = [{transform_indices = @transform_0, window_bounds = array<i64: 24, 64>}, {pipeline_mode = #tpu.pipeline_mode<synchronous>, transform_indices = @transform_1, window_bounds = array<i64: 64, 128>}, {pipeline_mode = #tpu.pipeline_mode<synchronous>, transform_indices = @transform_2, window_bounds = array<i64: 24, 128>}, {transform_indices = @transform_3, window_bounds = array<i64: 24, 128>}]} {
    %c0 = arith.constant 0 : index
    %c0_0 = arith.constant 0 : index
    %0 = vector.load %arg1[%c0, %c0_0] : memref<24x64xbf16, #tpu.memory_space<vmem>>, vector<24x64xbf16>
    %c0_1 = arith.constant 0 : index
    %c0_2 = arith.constant 0 : index
    %1 = vector.load %arg2[%c0_1, %c0_2] : memref<64x128xbf16, #tpu.memory_space<vmem>>, vector<64x128xbf16>
    %cst = arith.constant dense<0.000000e+00> : vector<24x128xf32>
    %2 = tpu.matmul %0, %1, %cst {dimension_numbers = #tpu.dot_dimension_numbers<[1], [0], [0], [1], [0, 0, 1, 1], [], []>} : vector<24x64xbf16>, vector<64x128xbf16>, vector<24x128xf32> -> vector<24x128xf32>
    %c0_3 = arith.constant 0 : index
    %c0_4 = arith.constant 0 : index
    %3 = vector.load %arg3[%c0_3, %c0_4] : memref<24x128xf32, #tpu.memory_space<vmem>>, vector<24x128xf32>
    %4 = arith.addf %2, %3 : vector<24x128xf32>
    %c0_5 = arith.constant 0 : index
    %c0_6 = arith.constant 0 : index
    %5 = vector.load %arg4[%c0_5, %c0_6] : memref<24x128xf32, #tpu.memory_space<vmem>>, vector<24x128xf32>
    tpu.vector_store %arg4[%c0_5, %c0_6], %4 {strides = array<i32>} : memref<24x128xf32, #tpu.memory_space<vmem>>, vector<24x128xf32>,
    return
  }
  func.func @transform_0(%arg0: i32) -> (i32, i32) {
    %c0_i32 = arith.constant 0 : i32
    %c0_i32_0 = arith.constant 0 : i32
    return %arg0, %c0_i32 : i32, i32
  }
  func.func @transform_1(%arg0: i32) -> (i32, i32) {
    %c0_i32 = arith.constant 0 : i32
    %c0_i32_0 = arith.constant 0 : i32
    %c0_i32_1 = arith.constant 0 : i32
    return %c0_i32, %c0_i32_0 : i32, i32
  }
  func.func @transform_2(%arg0: i32) -> (i32, i32) {
    %c0_i32 = arith.constant 0 : i32
    %c0_i32_0 = arith.constant 0 : i32
    %c0_i32_1 = arith.constant 0 : i32
    return %c0_i32, %c0_i32_0 : i32, i32
  }
  func.func @transform_3(%arg0: i32) -> (i32, i32) {
    %c0_i32 = arith.constant 0 : i32
    %c0_i32_0 = arith.constant 0 : i32
    return %arg0, %c0_i32 : i32, i32
  }
}

module attributes {stable_mosaic.version = 11 : i64} {
  func.func @_embeddings_kernel(%arg0: i32, %arg1: memref<24x64xbf16, #tpu.memory_space<vmem>>, %arg2: memref<64x128xbf16, #tpu.memory_space<vmem>>, %arg3: memref<24x128xf32, #tpu.memory_space<vmem>>, %arg4: memref<24x128xf32, #tpu.memory_space<vmem>>) attributes {dimension_semantics = [#tpu.dimension_semantics<parallel>], iteration_bounds = array<i64: 2>, scalar_prefetch = 0 : i64, scratch_operands = 0 : i64, tpu.core_type = #tpu.core_type<tc>, window_params = [{transform_indices = @transform_0, window_bounds = array<i64: 24, 64>}, {pipeline_mode = #tpu.pipeline_mode<synchronous>, transform_indices = @transform_1, window_bounds = array<i64: 64, 128>}, {pipeline_mode = #tpu.pipeline_mode<synchronous>, transform_indices = @transform_2, window_bounds = array<i64: 24, 128>}, {transform_indices = @transform_3, window_bounds = array<i64: 24, 128>}]} {
    %c0 = arith.constant 0 : index
    %c0_0 = arith.constant 0 : index
    %0 = vector.load %arg1[%c0, %c0_0] : memref<24x64xbf16, #tpu.memory_space<vmem>>, vector<24x64xbf16>
    %c0_1 = arith.constant 0 : index
    %c0_2 = arith.constant 0 : index
    %1 = vector.load %arg2[%c0_1, %c0_2] : memref<64x128xbf16, #tpu.memory_space<vmem>>, vector<64x128xbf16>
    %cst = arith.constant dense<0.000000e+00> : vector<24x128xf32>
    %2 = tpu.matmul %0, %1, %cst {dimension_numbers = #tpu.dot_dimension_numbers<[1], [0], [0], [1], [0, 0, 1, 1], [], []>} : vector<24x64xbf16>, vector<64x128xbf16>, vector<24x128xf32> -> vector<24x128xf32>
    %c0_3 = arith.constant 0 : index
    %c0_4 = arith.constant 0 : index
    %3 = vector.load %arg3[%c0_3, %c0_4] : memref<24x128xf32, #tpu.memory_space<vmem>>, vector<24x128xf32>
    %4 = arith.addf %2, %3 : vector<24x128xf32>
    %c0_5 = arith.constant 0 : index
    %c0_6 = arith.constant 0 : index
    %5 = vector.load %arg4[%c0_5, %c0_6] : memref<24x128xf32, #tpu.memory_space<vmem>>, vector<24x128xf32>
    tpu.vector_store %arg4[%c0_5, %c0_6], %4 {strides = array<i32>} : memref<24x128xf32, #tpu.memory_space<vmem>>, vector<24x128xf32>,
    return
  }
  func.func @transform_0(%arg0: i32) -> (i32, i32) {
    %c0_i32 = arith.constant 0 : i32
    %c0_i32_0 = arith.constant 0 : i32
    return %arg0, %c0_i32 : i32, i32
  }
  func.func @transform_1(%arg0: i32) -> (i32, i32) {
    %c0_i32 = arith.constant 0 : i32
    %c0_i32_0 = arith.constant 0 : i32
    %c0_i32_1 = arith.constant 0 : i32
    return %c0_i32, %c0_i32_0 : i32, i32
  }
  func.func @transform_2(%arg0: i32) -> (i32, i32) {
    %c0_i32 = arith.constant 0 : i32
    %c0_i32_0 = arith.constant 0 : i32
    %c0_i32_1 = arith.constant 0 : i32
    return %c0_i32, %c0_i32_0 : i32, i32
  }
  func.func @transform_3(%arg0: i32) -> (i32, i32) {
    %c0_i32 = arith.constant 0 : i32
    %c0_i32_0 = arith.constant 0 : i32
    return %arg0, %c0_i32 : i32, i32
  }
}

</mosaic_0001>

<bundles_post_ra>
// kernel: tpu_custom_call.1
= control target key start
LH: loop header
LB: loop body
LE: loop exit
PB: predicated region body
PF: predicated region fallthrough
CT: control target
= control target key end

     0   :  { %8 = vsyncpa [#allocation3], 0  ;;  %s928_s0 = inlined_call_operand.hbm [shape: bf16[48,64], index: 0, kind: input, shape index: {}]   ;;  %s929_s1 = inlined_call_operand.hbm [shape: bf16[64,128], index: 1, kind: input, shape index: {}]   ;;  %s930_s2 = inlined_call_operand.hbm [shape: f32[24,128], index: 2, kind: input, shape index: {}]   ;;  %s931_s3 = inlined_call_operand.hbm [shape: f32[48,128], index: 3, kind: output, shape index: {}]  }
   0x1   :  { %10 = vsyncpa [#allocation3 + $0x1], 0 }
   0x2   :  { %11 = vsyncpa [#allocation6], 0 }
   0x3   :  { %12 = vsyncpa [#allocation4], 0 }
   0x4   :  { %14 = vsyncpa [#allocation4 + $0x1], 0  ;;  %s733_s12 = smov 0   ;;  %s735_s13 = smov 0  }
   0x5   :  { %s737_s14 = smov 0   ;;  %s739_s15 = smov 0  }
   0x6 LB: > { %s754_s16 = sadd.s32 4294967295, %s701_s15   ;;  %s431_s17 = sadd.s32 4294967294, %s701_s15   ;;  %s701_s15 = sphi %s739_s15, %s952_s15   ;;  %s697_s14 = sphi %s737_s14, %s951_s14   ;;  %s693_s13 = sphi %s735_s13, %s950_s13   ;;  %s689_s12 = sphi %s733_s12, %s949_s12  }
   0x7   : > { %p40_p0 = scmp.ne.s32.totalorder %s693_s13, %s689_s12  ;;  %p932_p1 = scmp.eq.s32.totalorder %s754_s16, 0 }
   0x8   : > { %p106_p2 = scmp.eq.s32.totalorder %s754_s16, 1  ;;  %p112_p3 = scmp.eq.s32.totalorder %s431_s17, 1 }
   0x9   : > { %p763_p4 = por %p932_p1, %p40_p0  ;;  %p432_p5 = scmp.ge.s32.totalorder %s701_s15, 1 }
   0xa   : > { %p768_p6 = por %p112_p3, %p40_p0  ;;  %p119_p7 = scmp.lt.s32.totalorder %s701_s15, 3 }
   0xb   : > { %s936_s18 = scalar_select %p763_p4, 1, 0 }
   0xc   : > { %s937_s19 = scalar_select %p768_p6, 1, 0 }
   0xd   : > { %p773_p8 = pnand %p432_p5, %p119_p7  ;;  %s703_s21 = smov [#allocation5]  }
   0xe   : > { %s131_s22 = sshll.u32 %s703_s21, 4  ;;  %s704_s24 = smov [#allocation7]   ;;  %s132_s22 = int_to_ptr.vmem [resolvable:$true] %s131_s22 }
   0xf   : > { %s938_s20 = scalar_select %p773_p8, 1, 0 }
  0x10   : > { %p486_p9 = pneg %p773_p8  ;;  %s144_s25 = sshll.u32 %s704_s24, 4  ;;  %s145_s25 = int_to_ptr.vmem [resolvable:$true] %s144_s25 }
  0x11   : > { %s564_s26 = scalar_lea.vmem %s132_s22, 512  ;;  %p572_p5 = scmp.lt.s32.totalorder %s132_s22, %s132_s22 }
  0x12   : > { %p782_p11 = pnand %p486_p9, %p932_p1  ;;  %p565_p13 = scmp.ne.s32.totalorder %s132_s22, %s564_s26 }
  0x13   : > { %p573_p7 = scmp.lt.s32.totalorder %s564_s26, %s564_s26 }
  0x14   : > { %p555_p12 = pneg %p782_p11 }
  0x15   : > { %p574_p10 = por %p573_p7, %p572_p5 }
  0x16   : > { %p567_p0 = pnand %p565_p13, %p555_p12 }
  0x18   : > { %p568_p3 = pneg %p567_p0 }
  0x1a   : > { %p575_p9 = pnand %p574_p10, %p568_p3 }
  0x1c   : > { %578 = shalt.err (!%p575_p9)
}
  0x1d   : > { %s705_s27 = smov 64   ;;  %s706_s28 = smov 4  }
  0x1e   : > { %489 = dma.hbm_to_vmem [thread:$0]  (!%p782_p11), %s929_s1, 512, %s132_s22, [#allocation6], %s705_s27, %s705_s27, %s706_s28  }
  0x1f   : > { %s590_s4 = scalar_lea.vmem %s145_s25, 384  ;;  %p598_p10 = scmp.lt.s32.totalorder %s145_s25, %s145_s25 }
  0x20   : > { %p591_p13 = scmp.ne.s32.totalorder %s145_s25, %s590_s4  ;;  %p599_p3 = scmp.lt.s32.totalorder %s590_s4, %s590_s4 }
  0x22   : > { %p593_p0 = pnand %p591_p13, %p555_p12  ;;  %p600_p7 = por %p599_p3, %p598_p10 }
  0x24   : > { %p594_p5 = pneg %p593_p0 }
  0x26   : > { %p601_p9 = pnand %p600_p7, %p594_p5 }
  0x28   : > { %604 = shalt.err (!%p601_p9)
}
  0x29   : > { %s707_s5 = smov 128   ;;  %s708_s6 = smov 8  }
  0x2a   : > { %492 = dma.hbm_to_vmem [thread:$0]  (!%p782_p11), %s930_s2, 384, %s145_s25, [#allocation6], %s707_s5, %s707_s5, %s708_s6  }
  0x2b   : > { %s808_s9 = sadd.s32 1, %s701_s15   ;;  %s27_s11 = sadd.s32 1, %s697_s14 }
  0x2c   : > { %s24_s10 = ssub.s32 %s701_s15, %s808_s9  ;;  %p34_p13 = scmp.ne.s32.totalorder %s697_s14, %s693_s13 }
  0x2d   : > { %p25_p12 = scmp.eq.s32.totalorder %s24_s10, 0  ;;  %p35_p0 = scmp.eq.s32.totalorder %s701_s15, 0 }
  0x2e   : > { %p821_p10 = por %p106_p2, %p34_p13  ;;  %p503_p3 = scmp.lt.s32.totalorder %s701_s15, 2 }
  0x2f   : > { %s817_s17 = scalar_select %p25_p12, %s697_s14, %s27_s11  }
  0x30   : > { %p36_p5 = por %p35_p0, %p34_p13  ;;  %s158_s22 = sand.u32 1, %s697_s14  }
  0x31   : > { %s940_s21 = scalar_select %p821_p10, 1, 0 }
  0x32   : > { %s471_s23 = smul.u32 12, %s158_s22  ;;  %p828_p11 = pnand %p503_p3, %p36_p5 }
  0x33   : > { %s451_s24 = smul.u32 192, %s701_s15  ;;  %s839_s6 = scalar_lea.sflag [#allocation3], %s158_s22 }
  0x34   : > { %s162_s4 = scalar_lea.vmem [#allocation2], %s471_s23  ;;  %p607_p7 = pneg %p828_p11 }
  0x35   : > { %s835_s30 = scalar_lea.hbm %s928_s0, %s451_s24  ;;  %s169_s5 = sshll.u32 %s162_s4, 4  ;;  %s837_s5 = int_to_ptr.vmem [resolvable:$true] %s169_s5 }
  0x36   : > { %s605_s7 = scalar_lea.hbm %s835_s30, 192  ;;  %s610_s11 = scalar_lea.hbm %s928_s0, 384 }
  0x37   : > { %p606_p2 = scmp.ne.s32.totalorder %s835_s30, %s605_s7  ;;  %p611_p13 = scmp.lt.s32.totalorder %s835_s30, %s928_s0 }
  0x38   : > { %p612_p0 = scmp.lt.s32.totalorder %s610_s11, %s605_s7 }
  0x39   : > { %p608_p9 = pnand %p607_p7, %p606_p2 }
  0x3a   : > { %p613_p5 = por %p612_p0, %p611_p13 }
  0x3b   : > { %p609_p12 = pneg %p608_p9 }
  0x3d   : > { %p614_p3 = pnand %p613_p5, %p609_p12 }
  0x3f   : > { %617 = shalt.err (!%p614_p3)
}
  0x40   : > { %s618_s22 = scalar_lea.vmem %s837_s5, 192  ;;  %s709_s23 = smov [#allocation2]  }
  0x41   : > { %p619_p1 = scmp.ne.s32.totalorder %s837_s5, %s618_s22  ;;  %s623_s29 = sshll.u32 %s709_s23, 4  ;;  %s624_s29 = int_to_ptr.vmem [resolvable:$false] %s623_s29 }
  0x42   : > { %s625_s4 = scalar_lea.vmem %s624_s29, 384  ;;  %p626_p9 = scmp.lt.s32.totalorder %s837_s5, %s624_s29 }
  0x43   : > { %p621_p6 = pnand %p619_p1, %p607_p7  ;;  %p627_p10 = scmp.lt.s32.totalorder %s625_s4, %s618_s22 }
  0x45   : > { %p622_p2 = pneg %p621_p6  ;;  %p628_p4 = por %p627_p10, %p626_p9 }
  0x47   : > { %p629_p8 = pnand %p628_p4, %p622_p2 }
  0x49   : > { %632 = shalt.err (!%p629_p8)
}
  0x4a   : > { %496 = dma.hbm_to_vmem [thread:$0]  (!%p828_p11), %s835_s30, 192, %s837_s5, %s839_s6, %s705_s27, %s705_s27, %s706_s28  }
  0x4b   : > { %p942_p1 = scmp.ne.s32.totalorder %s938_s20, 0 }
  0x4c   : > { %s866_s7 = sand.u32 (!%p942_p1), 1, %s693_s13   ;;  %p943_p4 = scmp.ne.s32.totalorder (!%p942_p1), %s936_s18, 0 }
  0x4d   : > { %181 = sbr.rel (%p942_p1) target bundleno = 318 (0x13e), region = 32  ;;  %s184_s10 = scalar_lea.sflag (!%p942_p1), [#allocation3], %s866_s7 }
  0x4e   : > { %s472_s8 = smul.u32 (!%p942_p1), 12, %s866_s7 }
  0x50   : > { %s187_s11 = scalar_lea.vmem (!%p942_p1), [#allocation2], %s472_s8 }
  0x52   : > { %676 = dma.done.wait (%p943_p4), %s184_s10, 192  }
  0x53   : > { %678 = vsyncadd (%p943_p4), %s184_s10, 4294967104  ;;  %p944_p6 = scmp.eq.s32.totalorder %s754_s16, 0 }
  0x55   : > { %680 = dma.done.wait (%p944_p6), [#allocation6], 896   ;;  %p945_p8 = pmov %p944_p6 }
  0x56   : > { %v547_v0 = vld [vmem:[#allocation5 + $0x18] sm:$0xff]   ;;  %v548_v1 = vld [vmem:[#allocation5 + $0x10] sm:$0xff]   ;;  %v549_v2 = vld [vmem:[#allocation5 + $0x8] sm:$0xff]   ;;  %vm267_vm0 = vcmask 523264   ;;  %s473_s18 = smul.u32 24, %s866_s7  ;;  %s326_s6 = scalar_lea.sflag [#allocation4], %s866_s7 }
  0x57   : > { %682 = vsyncadd (%p945_p8), [#allocation6], 4294966400  ;;  %459 = vmatprep.subr.bf16.mxu0 %v547_v0  ;;  %v551_v3 = vld [vmem:[%s187_s11] sm:$0xff]   ;;  %v550_v4 = vld [vmem:[#allocation5] sm:$0xff]   ;;  %s452_s28 = smul.u32 384, %s754_s16  ;;  %p946_p11 = scmp.ne.s32.totalorder %s940_s21, 0 }
  0x58   : > { %460 = vmatpush3.bf16.msra.mxu0 %v547_v0  ;;  %467 = vmatprep.mubr.msk.bf16.mxu0 %vm267_vm0, %v551_v3  ;;  %v552_v5 = vld [vmem:[%s187_s11 + $0x8] ss:$0 sps:$4 sm:$0xff]   ;;  %v232_v8 = vld [vmem:[#allocation7] sm:$0xff]  ;;  %s217_s20 = scalar_lea.vmem [#allocation8], %s473_s18  ;;  %v233_v13 = vld [vmem:[#allocation7 + $0x8] sm:$0xff]  ;;  %s710_s24 = smov [#allocation8]  }
  0x59   : > { %461 = vmatprep.subr.bf16.mxu0 %v548_v1  ;;  %v234_v6 = vld [vmem:[#allocation7 + $0x10] sm:$0xff]  ;;  %s339_s27 = sshll.u32 %s217_s20, 4  ;;  %s885_s5 = scalar_lea.hbm %s931_s3, %s452_s28  ;;  %s880_s27 = int_to_ptr.vmem [resolvable:$true] %s339_s27 }
  0x5a   : > { %s633_s16 = scalar_lea.vmem %s880_s27, 384  ;;  %s637_s26 = sshll.u32 %s710_s24, 4  ;;  %s638_s26 = int_to_ptr.vmem [resolvable:$false] %s637_s26 }
  0x5b   : > { %p634_p10 = scmp.ne.s32.totalorder %s880_s27, %s633_s16  ;;  %s639_s22 = scalar_lea.vmem %s638_s26, 768 }
  0x5c   : > { %462 = vmatpush3.bf16.msra.mxu0 %v548_v1  ;;  %p640_p13 = scmp.lt.s32.totalorder %s880_s27, %s638_s26  ;;  %p641_p0 = scmp.lt.s32.totalorder %s639_s22, %s633_s16 }
  0x5d   : > { %463 = vmatprep.subr.bf16.mxu0 %v549_v2  ;;  %p635_p7 = pnand %p634_p10, %p946_p11 }
  0x5e   : > { %p642_p5 = por %p641_p0, %p640_p13 }
  0x5f   : > { %p636_p12 = pneg %p635_p7 }
  0x60   : > { %464 = vmatpush3.bf16.msra.mxu0 %v549_v2 }
  0x61   : > { %465 = vmatprep.subr.bf16.mxu0 %v550_v4  ;;  %p643_p3 = pnand %p642_p5, %p636_p12 }
  0x64   : > { %466 = vmatpush3.bf16.msra.mxu0 %v550_v4 }
  0x67   : > { %468 = vmatmul.mubr.msk.bf16.vlgmr.msra.gmra.mxu0 %vm267_vm0, %v552_v5 }
 0x127   : > { %v469_v7 = vpop.f32.mrf.mxu0 }
 0x128   : > { %v317_v9 = vadd.f32 %v469_v7, %v234_v6 }
 0x129   : > { %v308_v10 = vpop.f32.mrf.mxu0 }
 0x12a   : > { %324 = vst [vmem:[%s217_s20 + $0x10] sm:$0xff] %v317_v9  ;;  %v309_v11 = vadd.f32 %v308_v10, %v232_v8 }
 0x12b   : > { %v470_v12 = vpop.f32.mrf.mxu0 }
 0x12c   : > { %322 = vst [vmem:[%s217_s20] sm:$0xff] %v309_v11 }
 0x12d   : > { %v311_v14 = vpop.f32.mrf.mxu0 }
 0x12e   : > { %v312_v15 = vadd.f32 %v311_v14, %v233_v13 }
 0x130   : > { %323 = vst [vmem:[%s217_s20 + $0x8] sm:$0xff] %v312_v15 }
 0x131   : > { %646 = shalt.err (!%p643_p3)
}
 0x132   : > { %s647_s23 = scalar_lea.hbm %s885_s5, 384  ;;  %s651_s8 = scalar_lea.hbm %s931_s3, 768 }
 0x133   : > { %p648_p2 = scmp.ne.s32.totalorder %s885_s5, %s647_s23  ;;  %p652_p4 = scmp.lt.s32.totalorder %s885_s5, %s931_s3 }
 0x134   : > { %p653_p6 = scmp.lt.s32.totalorder %s651_s8, %s647_s23 }
 0x135   : > { %p649_p9 = pnand %p648_p2, %p946_p11 }
 0x136   : > { %p654_p8 = por %p653_p6, %p652_p4 }
 0x137   : > { %p650_p1 = pneg %p649_p9 }
 0x139   : > { %p655_p10 = pnand %p654_p8, %p650_p1 }
 0x13b   : > { %658 = shalt.err (!%p655_p10)
}
 0x13c   : > { %s711_s18 = smov 128   ;;  %s712_s20 = smov 8  }
 0x13d   : > { %484 = dma.vmem_to_hbm [thread:$0]  (%p946_p11), %s880_s27, 384, %s885_s5, %s326_s6, %s711_s18, %s711_s18, %s712_s20  }
 0x13e PF: > { %s354_s28 = sand.u32 1, %s689_s12   ;;  %p947_p7 = scmp.ne.s32.totalorder %s937_s19, 0 }
 0x13f   : > { %p948_p12 = scmp.ge.s32.totalorder %s701_s15, 2  ;;  %s355_s25 = scalar_lea.sflag [#allocation4], %s354_s28 }
 0x141   : > { %p498_p13 = pnand %p948_p12, %p947_p7 }
 0x143   : > { %p499_p0 = pneg %p498_p13 }
 0x145   : > { %684 = dma.done.wait (%p499_p0), %s355_s25, 384  }
 0x146   : > { %686 = vsyncadd (%p499_p0), %s355_s25, 4294966912  ;;  %p17_p5 = scmp.ge.s32.totalorder %s808_s9, 4   ;;  %s949_s12 = smov %s693_s13 }
 0x147   : > { %s950_s13 = smov %s697_s14  ;;  %s951_s14 = smov %s817_s17 }
 0x148   : > { %s952_s15 = smov %s808_s9  ;;  %19 = sbr.rel (!%p17_p5) target bundleno = 6 (0x6), region = 85 }
 0x14d   :  { %360 = vsyncpa [#allocation3], 1 }
 0x14e   :  { %362 = vsyncpa [#allocation3 + $0x1], 1 }
 0x14f   :  { %363 = vsyncpa [#allocation6], 1 }
 0x150   :  { %364 = vsyncpa [#allocation4], 1 }
 0x151   :  { %366 = vsyncpa [#allocation4 + $0x1], 1 }

// kernel: tpu_custom_call.1
= control target key start
LH: loop header
LB: loop body
LE: loop exit
PB: predicated region body
PF: predicated region fallthrough
CT: control target
= control target key end

     0   :  { %8 = vsyncpa [#allocation3], 0  ;;  %s928_s0 = inlined_call_operand.hbm [shape: bf16[48,64], index: 0, kind: input, shape index: {}]   ;;  %s929_s1 = inlined_call_operand.hbm [shape: bf16[64,128], index: 1, kind: input, shape index: {}]   ;;  %s930_s2 = inlined_call_operand.hbm [shape: f32[24,128], index: 2, kind: input, shape index: {}]   ;;  %s931_s3 = inlined_call_operand.hbm [shape: f32[48,128], index: 3, kind: output, shape index: {}]  }
   0x1   :  { %10 = vsyncpa [#allocation3 + $0x1], 0 }
   0x2   :  { %11 = vsyncpa [#allocation6], 0 }
   0x3   :  { %12 = vsyncpa [#allocation4], 0 }
   0x4   :  { %14 = vsyncpa [#allocation4 + $0x1], 0  ;;  %s733_s12 = smov 0   ;;  %s735_s13 = smov 0  }
   0x5   :  { %s737_s14 = smov 0   ;;  %s739_s15 = smov 0  }
   0x6 LB: > { %s754_s16 = sadd.s32 4294967295, %s701_s15   ;;  %s431_s17 = sadd.s32 4294967294, %s701_s15   ;;  %s701_s15 = sphi %s739_s15, %s952_s15   ;;  %s697_s14 = sphi %s737_s14, %s951_s14   ;;  %s693_s13 = sphi %s735_s13, %s950_s13   ;;  %s689_s12 = sphi %s733_s12, %s949_s12  }
   0x7   : > { %p40_p0 = scmp.ne.s32.totalorder %s693_s13, %s689_s12  ;;  %p932_p1 = scmp.eq.s32.totalorder %s754_s16, 0 }
   0x8   : > { %p106_p2 = scmp.eq.s32.totalorder %s754_s16, 1  ;;  %p112_p3 = scmp.eq.s32.totalorder %s431_s17, 1 }
   0x9   : > { %p763_p4 = por %p932_p1, %p40_p0  ;;  %p432_p5 = scmp.ge.s32.totalorder %s701_s15, 1 }
   0xa   : > { %p768_p6 = por %p112_p3, %p40_p0  ;;  %p119_p7 = scmp.lt.s32.totalorder %s701_s15, 3 }
   0xb   : > { %s936_s18 = scalar_select %p763_p4, 1, 0 }
   0xc   : > { %s937_s19 = scalar_select %p768_p6, 1, 0 }
   0xd   : > { %p773_p8 = pnand %p432_p5, %p119_p7  ;;  %s703_s21 = smov [#allocation5]  }
   0xe   : > { %s131_s22 = sshll.u32 %s703_s21, 4  ;;  %s704_s24 = smov [#allocation7]   ;;  %s132_s22 = int_to_ptr.vmem [resolvable:$true] %s131_s22 }
   0xf   : > { %s938_s20 = scalar_select %p773_p8, 1, 0 }
  0x10   : > { %p486_p9 = pneg %p773_p8  ;;  %s144_s25 = sshll.u32 %s704_s24, 4  ;;  %s145_s25 = int_to_ptr.vmem [resolvable:$true] %s144_s25 }
  0x11   : > { %s564_s26 = scalar_lea.vmem %s132_s22, 512  ;;  %p572_p5 = scmp.lt.s32.totalorder %s132_s22, %s132_s22 }
  0x12   : > { %p782_p11 = pnand %p486_p9, %p932_p1  ;;  %p565_p13 = scmp.ne.s32.totalorder %s132_s22, %s564_s26 }
  0x13   : > { %p573_p7 = scmp.lt.s32.totalorder %s564_s26, %s564_s26 }
  0x14   : > { %p555_p12 = pneg %p782_p11 }
  0x15   : > { %p574_p10 = por %p573_p7, %p572_p5 }
  0x16   : > { %p567_p0 = pnand %p565_p13, %p555_p12 }
  0x18   : > { %p568_p3 = pneg %p567_p0 }
  0x1a   : > { %p575_p9 = pnand %p574_p10, %p568_p3 }
  0x1c   : > { %578 = shalt.err (!%p575_p9)
}
  0x1d   : > { %s705_s27 = smov 64   ;;  %s706_s28 = smov 4  }
  0x1e   : > { %489 = dma.hbm_to_vmem [thread:$0]  (!%p782_p11), %s929_s1, 512, %s132_s22, [#allocation6], %s705_s27, %s705_s27, %s706_s28  }
  0x1f   : > { %s590_s4 = scalar_lea.vmem %s145_s25, 384  ;;  %p598_p10 = scmp.lt.s32.totalorder %s145_s25, %s145_s25 }
  0x20   : > { %p591_p13 = scmp.ne.s32.totalorder %s145_s25, %s590_s4  ;;  %p599_p3 = scmp.lt.s32.totalorder %s590_s4, %s590_s4 }
  0x22   : > { %p593_p0 = pnand %p591_p13, %p555_p12  ;;  %p600_p7 = por %p599_p3, %p598_p10 }
  0x24   : > { %p594_p5 = pneg %p593_p0 }
  0x26   : > { %p601_p9 = pnand %p600_p7, %p594_p5 }
  0x28   : > { %604 = shalt.err (!%p601_p9)
}
  0x29   : > { %s707_s5 = smov 128   ;;  %s708_s6 = smov 8  }
  0x2a   : > { %492 = dma.hbm_to_vmem [thread:$0]  (!%p782_p11), %s930_s2, 384, %s145_s25, [#allocation6], %s707_s5, %s707_s5, %s708_s6  }
  0x2b   : > { %s808_s9 = sadd.s32 1, %s701_s15   ;;  %s27_s11 = sadd.s32 1, %s697_s14 }
  0x2c   : > { %s24_s10 = ssub.s32 %s701_s15, %s808_s9  ;;  %p34_p13 = scmp.ne.s32.totalorder %s697_s14, %s693_s13 }
  0x2d   : > { %p25_p12 = scmp.eq.s32.totalorder %s24_s10, 0  ;;  %p35_p0 = scmp.eq.s32.totalorder %s701_s15, 0 }
  0x2e   : > { %p821_p10 = por %p106_p2, %p34_p13  ;;  %p503_p3 = scmp.lt.s32.totalorder %s701_s15, 2 }
  0x2f   : > { %s817_s17 = scalar_select %p25_p12, %s697_s14, %s27_s11  }
  0x30   : > { %p36_p5 = por %p35_p0, %p34_p13  ;;  %s158_s22 = sand.u32 1, %s697_s14  }
  0x31   : > { %s940_s21 = scalar_select %p821_p10, 1, 0 }
  0x32   : > { %s471_s23 = smul.u32 12, %s158_s22  ;;  %p828_p11 = pnand %p503_p3, %p36_p5 }
  0x33   : > { %s451_s24 = smul.u32 192, %s701_s15  ;;  %s839_s6 = scalar_lea.sflag [#allocation3], %s158_s22 }
  0x34   : > { %s162_s4 = scalar_lea.vmem [#allocation2], %s471_s23  ;;  %p607_p7 = pneg %p828_p11 }
  0x35   : > { %s835_s30 = scalar_lea.hbm %s928_s0, %s451_s24  ;;  %s169_s5 = sshll.u32 %s162_s4, 4  ;;  %s837_s5 = int_to_ptr.vmem [resolvable:$true] %s169_s5 }
  0x36   : > { %s605_s7 = scalar_lea.hbm %s835_s30, 192  ;;  %s610_s11 = scalar_lea.hbm %s928_s0, 384 }
  0x37   : > { %p606_p2 = scmp.ne.s32.totalorder %s835_s30, %s605_s7  ;;  %p611_p13 = scmp.lt.s32.totalorder %s835_s30, %s928_s0 }
  0x38   : > { %p612_p0 = scmp.lt.s32.totalorder %s610_s11, %s605_s7 }
  0x39   : > { %p608_p9 = pnand %p607_p7, %p606_p2 }
  0x3a   : > { %p613_p5 = por %p612_p0, %p611_p13 }
  0x3b   : > { %p609_p12 = pneg %p608_p9 }
  0x3d   : > { %p614_p3 = pnand %p613_p5, %p609_p12 }
  0x3f   : > { %617 = shalt.err (!%p614_p3)
}
  0x40   : > { %s618_s22 = scalar_lea.vmem %s837_s5, 192  ;;  %s709_s23 = smov [#allocation2]  }
  0x41   : > { %p619_p1 = scmp.ne.s32.totalorder %s837_s5, %s618_s22  ;;  %s623_s29 = sshll.u32 %s709_s23, 4  ;;  %s624_s29 = int_to_ptr.vmem [resolvable:$false] %s623_s29 }
  0x42   : > { %s625_s4 = scalar_lea.vmem %s624_s29, 384  ;;  %p626_p9 = scmp.lt.s32.totalorder %s837_s5, %s624_s29 }
  0x43   : > { %p621_p6 = pnand %p619_p1, %p607_p7  ;;  %p627_p10 = scmp.lt.s32.totalorder %s625_s4, %s618_s22 }
  0x45   : > { %p622_p2 = pneg %p621_p6  ;;  %p628_p4 = por %p627_p10, %p626_p9 }
  0x47   : > { %p629_p8 = pnand %p628_p4, %p622_p2 }
  0x49   : > { %632 = shalt.err (!%p629_p8)
}
  0x4a   : > { %496 = dma.hbm_to_vmem [thread:$0]  (!%p828_p11), %s835_s30, 192, %s837_s5, %s839_s6, %s705_s27, %s705_s27, %s706_s28  }
  0x4b   : > { %p942_p1 = scmp.ne.s32.totalorder %s938_s20, 0 }
  0x4c   : > { %s866_s7 = sand.u32 (!%p942_p1), 1, %s693_s13   ;;  %p943_p4 = scmp.ne.s32.totalorder (!%p942_p1), %s936_s18, 0 }
  0x4d   : > { %181 = sbr.rel (%p942_p1) target bundleno = 318 (0x13e), region = 32  ;;  %s184_s10 = scalar_lea.sflag (!%p942_p1), [#allocation3], %s866_s7 }
  0x4e   : > { %s472_s8 = smul.u32 (!%p942_p1), 12, %s866_s7 }
  0x50   : > { %s187_s11 = scalar_lea.vmem (!%p942_p1), [#allocation2], %s472_s8 }
  0x52   : > { %676 = dma.done.wait (%p943_p4), %s184_s10, 192  }
  0x53   : > { %678 = vsyncadd (%p943_p4), %s184_s10, 4294967104  ;;  %p944_p6 = scmp.eq.s32.totalorder %s754_s16, 0 }
  0x55   : > { %680 = dma.done.wait (%p944_p6), [#allocation6], 896   ;;  %p945_p8 = pmov %p944_p6 }
  0x56   : > { %v547_v0 = vld [vmem:[#allocation5 + $0x18] sm:$0xff]   ;;  %v548_v1 = vld [vmem:[#allocation5 + $0x10] sm:$0xff]   ;;  %v549_v2 = vld [vmem:[#allocation5 + $0x8] sm:$0xff]   ;;  %vm267_vm0 = vcmask 523264   ;;  %s473_s18 = smul.u32 24, %s866_s7  ;;  %s326_s6 = scalar_lea.sflag [#allocation4], %s866_s7 }
  0x57   : > { %682 = vsyncadd (%p945_p8), [#allocation6], 4294966400  ;;  %459 = vmatprep.subr.bf16.mxu0 %v547_v0  ;;  %v551_v3 = vld [vmem:[%s187_s11] sm:$0xff]   ;;  %v550_v4 = vld [vmem:[#allocation5] sm:$0xff]   ;;  %s452_s28 = smul.u32 384, %s754_s16  ;;  %p946_p11 = scmp.ne.s32.totalorder %s940_s21, 0 }
  0x58   : > { %460 = vmatpush3.bf16.msra.mxu0 %v547_v0  ;;  %467 = vmatprep.mubr.msk.bf16.mxu0 %vm267_vm0, %v551_v3  ;;  %v552_v5 = vld [vmem:[%s187_s11 + $0x8] ss:$0 sps:$4 sm:$0xff]   ;;  %v232_v8 = vld [vmem:[#allocation7] sm:$0xff]  ;;  %s217_s20 = scalar_lea.vmem [#allocation8], %s473_s18  ;;  %v233_v13 = vld [vmem:[#allocation7 + $0x8] sm:$0xff]  ;;  %s710_s24 = smov [#allocation8]  }
  0x59   : > { %461 = vmatprep.subr.bf16.mxu0 %v548_v1  ;;  %v234_v6 = vld [vmem:[#allocation7 + $0x10] sm:$0xff]  ;;  %s339_s27 = sshll.u32 %s217_s20, 4  ;;  %s885_s5 = scalar_lea.hbm %s931_s3, %s452_s28  ;;  %s880_s27 = int_to_ptr.vmem [resolvable:$true] %s339_s27 }
  0x5a   : > { %s633_s16 = scalar_lea.vmem %s880_s27, 384  ;;  %s637_s26 = sshll.u32 %s710_s24, 4  ;;  %s638_s26 = int_to_ptr.vmem [resolvable:$false] %s637_s26 }
  0x5b   : > { %p634_p10 = scmp.ne.s32.totalorder %s880_s27, %s633_s16  ;;  %s639_s22 = scalar_lea.vmem %s638_s26, 768 }
  0x5c   : > { %462 = vmatpush3.bf16.msra.mxu0 %v548_v1  ;;  %p640_p13 = scmp.lt.s32.totalorder %s880_s27, %s638_s26  ;;  %p641_p0 = scmp.lt.s32.totalorder %s639_s22, %s633_s16 }
  0x5d   : > { %463 = vmatprep.subr.bf16.mxu0 %v549_v2  ;;  %p635_p7 = pnand %p634_p10, %p946_p11 }
  0x5e   : > { %p642_p5 = por %p641_p0, %p640_p13 }
  0x5f   : > { %p636_p12 = pneg %p635_p7 }
  0x60   : > { %464 = vmatpush3.bf16.msra.mxu0 %v549_v2 }
  0x61   : > { %465 = vmatprep.subr.bf16.mxu0 %v550_v4  ;;  %p643_p3 = pnand %p642_p5, %p636_p12 }
  0x64   : > { %466 = vmatpush3.bf16.msra.mxu0 %v550_v4 }
  0x67   : > { %468 = vmatmul.mubr.msk.bf16.vlgmr.msra.gmra.mxu0 %vm267_vm0, %v552_v5 }
 0x127   : > { %v469_v7 = vpop.f32.mrf.mxu0 }
 0x128   : > { %v317_v9 = vadd.f32 %v469_v7, %v234_v6 }
 0x129   : > { %v308_v10 = vpop.f32.mrf.mxu0 }
 0x12a   : > { %324 = vst [vmem:[%s217_s20 + $0x10] sm:$0xff] %v317_v9  ;;  %v309_v11 = vadd.f32 %v308_v10, %v232_v8 }
 0x12b   : > { %v470_v12 = vpop.f32.mrf.mxu0 }
 0x12c   : > { %322 = vst [vmem:[%s217_s20] sm:$0xff] %v309_v11 }
 0x12d   : > { %v311_v14 = vpop.f32.mrf.mxu0 }
 0x12e   : > { %v312_v15 = vadd.f32 %v311_v14, %v233_v13 }
 0x130   : > { %323 = vst [vmem:[%s217_s20 + $0x8] sm:$0xff] %v312_v15 }
 0x131   : > { %646 = shalt.err (!%p643_p3)
}
 0x132   : > { %s647_s23 = scalar_lea.hbm %s885_s5, 384  ;;  %s651_s8 = scalar_lea.hbm %s931_s3, 768 }
 0x133   : > { %p648_p2 = scmp.ne.s32.totalorder %s885_s5, %s647_s23  ;;  %p652_p4 = scmp.lt.s32.totalorder %s885_s5, %s931_s3 }
 0x134   : > { %p653_p6 = scmp.lt.s32.totalorder %s651_s8, %s647_s23 }
 0x135   : > { %p649_p9 = pnand %p648_p2, %p946_p11 }
 0x136   : > { %p654_p8 = por %p653_p6, %p652_p4 }
 0x137   : > { %p650_p1 = pneg %p649_p9 }
 0x139   : > { %p655_p10 = pnand %p654_p8, %p650_p1 }
 0x13b   : > { %658 = shalt.err (!%p655_p10)
}
 0x13c   : > { %s711_s18 = smov 128   ;;  %s712_s20 = smov 8  }
 0x13d   : > { %484 = dma.vmem_to_hbm [thread:$0]  (%p946_p11), %s880_s27, 384, %s885_s5, %s326_s6, %s711_s18, %s711_s18, %s712_s20  }
 0x13e PF: > { %s354_s28 = sand.u32 1, %s689_s12   ;;  %p947_p7 = scmp.ne.s32.totalorder %s937_s19, 0 }
 0x13f   : > { %p948_p12 = scmp.ge.s32.totalorder %s701_s15, 2  ;;  %s355_s25 = scalar_lea.sflag [#allocation4], %s354_s28 }
 0x141   : > { %p498_p13 = pnand %p948_p12, %p947_p7 }
 0x143   : > { %p499_p0 = pneg %p498_p13 }
 0x145   : > { %684 = dma.done.wait (%p499_p0), %s355_s25, 384  }
 0x146   : > { %686 = vsyncadd (%p499_p0), %s355_s25, 4294966912  ;;  %p17_p5 = scmp.ge.s32.totalorder %s808_s9, 4   ;;  %s949_s12 = smov %s693_s13 }
 0x147   : > { %s950_s13 = smov %s697_s14  ;;  %s951_s14 = smov %s817_s17 }
 0x148   : > { %s952_s15 = smov %s808_s9  ;;  %19 = sbr.rel (!%p17_p5) target bundleno = 6 (0x6), region = 85 }
 0x14d   :  { %360 = vsyncpa [#allocation3], 1 }
 0x14e   :  { %362 = vsyncpa [#allocation3 + $0x1], 1 }
 0x14f   :  { %363 = vsyncpa [#allocation6], 1 }
 0x150   :  { %364 = vsyncpa [#allocation4], 1 }
 0x151   :  { %366 = vsyncpa [#allocation4 + $0x1], 1 }

</bundles_post_ra>
